<compile_context>
chip_gen: v6e
topology: v6e:2x2x1
jax: 0.10.0
libtpu: 0.0.40
codegen_flags: <defaults>
</compile_context>

<pallas_src>
import functools

import jax
import jax.numpy as jnp
from jax.experimental import pallas as pl
from jax.experimental.pallas import tpu as pltpu


def regression_net_kernel(x_ref, w1_ref, b1_ref, w2_ref, b2_ref, w3_ref, b3_ref, o_ref):
    # x_ref: (1, TILE_N)  -- batch along lanes
    x_row = x_ref[...]

    # fc1 + Sigmoid: (H,1) * (1,TILE_N) + (H,1) -> (H,TILE_N).  Pure VPU/EUP,
    # keeps the degenerate K=1 outer product off the MXU.
    h1 = jax.nn.sigmoid(w1_ref[...] * x_row + b1_ref[...])

    # fc2 + Tanh: (H,H) @ (H,TILE_N) on the MXU, f32 accumulation.
    h2 = jnp.tanh(
        jnp.dot(w2_ref[...], h1, preferred_element_type=jnp.float32) + b2_ref[...]
    )

    # fc3: VPU multiply + cross-sublane (XLU) reduce instead of a (1,H) matmul.
    out = jnp.sum(w3_ref[...] * h2, axis=0, keepdims=True) + b3_ref[...]

    o_ref[...] = out.astype(o_ref.dtype)


@functools.partial(jax.jit, static_argnames=("tile_n",))
def regression_net_forward(x, params, *, tile_n=4096):
    """x: (N, 1) float32. params: dict with (in, out)-layout weights (see init_params)."""
    n = x.shape[0]
    h = params["w2"].shape[0]
    dtype = x.dtype

    # --- repack params into the kernel's batch-on-lanes layout (tiny, one-off) ---
    w1c = params["w1"].reshape(h, 1)      # (1,H) -> (H,1) column
    b1c = params["b1"].reshape(h, 1)      # (1,H) -> (H,1)
    w2t = params["w2"].T                  # (in,out) -> (out,in) for W2 @ h1
    b2c = params["b2"].reshape(h, 1)
    w3c = params["w3"].reshape(h, 1)      # already a (H,1) column
    b3c = params["b3"].reshape(1, 1)

    # --- lane-aligned padding of the batch axis ---
    n_pad = ((n + 127) // 128) * 128                 # at least one full lane group
    tile = min(tile_n, n_pad)
    n_pad = ((n_pad + tile - 1) // tile) * tile      # multiple of the tile
    xt = x.reshape(1, n)                             # (N,1) -> (1,N), free reshape
    if n_pad != n:
        xt = jnp.pad(xt, ((0, 0), (0, n_pad - n)))

    grid = (n_pad // tile,)

    resident = lambda shape: pl.BlockSpec(shape, lambda i: tuple(0 for _ in shape))
    batch_spec = pl.BlockSpec((1, tile), lambda i: (0, i))

    cost = pl.CostEstimate(
        flops=2 * n * h * h + 4 * n * h,
        transcendentals=2 * n * h,
        bytes_accessed=4 * (2 * n + 2 * h + h * h + 2 * h + 1),
    )

    out_t = pl.pallas_call(
        regression_net_kernel,
        out_shape=jax.ShapeDtypeStruct((1, n_pad), dtype),
        grid=grid,
        in_specs=[
            batch_spec,                 # x^T tile
            resident((h, 1)),           # w1 column
            resident((h, 1)),           # b1 column
            resident((h, h)),           # w2 (out, in)
            resident((h, 1)),           # b2 column
            resident((h, 1)),           # w3 column
            resident((1, 1)),           # b3 scalar
        ],
        out_specs=batch_spec,
        compiler_params=pltpu.CompilerParams(
            dimension_semantics=("parallel",),
        ),
        cost_estimate=cost,
    )(xt, w1c, b1c, w2t, b2c, w3c, b3c)

    return out_t[:, :n].reshape(n, 1)


def init_params(n_hidden, key):
    """Deterministic init matching torch.nn.Linear's U(-1/sqrt(fan_in), 1/sqrt(fan_in)).

    Weights are stored as (in_features, out_features), biases as (1, out_features),
    so the pure-JAX reference is simply x @ W + b.
    """
    keys = jax.random.split(key, 6)

    def linear(kw, kb, fan_in, fan_out):
        bound = 1.0 / jnp.sqrt(jnp.float32(fan_in))
        w = jax.random.uniform(kw, (fan_in, fan_out), jnp.float32, -bound, bound)
        b = jax.random.uniform(kb, (1, fan_out), jnp.float32, -bound, bound)
        return w, b

    w1, b1 = linear(keys[0], keys[1], 1, n_hidden)
    w2, b2 = linear(keys[2], keys[3], n_hidden, n_hidden)
    w3, b3 = linear(keys[4], keys[5], n_hidden, 1)
    return {"w1": w1, "b1": b1, "w2": w2, "b2": b2, "w3": w3, "b3": b3}


def reference_forward(x, p):
    h1 = jax.nn.sigmoid(x @ p["w1"] + p["b1"])
    h2 = jnp.tanh(h1 @ p["w2"] + p["b2"])
    return h2 @ p["w3"] + p["b3"]


if __name__ == "__main__":
    n_hidden = 32
    batch = 8

    key = jax.random.PRNGKey(0)
    k_x, k_params = jax.random.split(key)

    # Input shaped like the PyTorch module expects: (batch, 1)
    x = jax.random.normal(k_x, (batch, 1), dtype=jnp.float32)
    params = init_params(n_hidden, k_params)

    out = regression_net_forward(x, params)
    out = jax.block_until_ready(out)
    ref = reference_forward(x, params)
    assert out.shape == (batch, 1)
    assert jnp.allclose(out, ref, atol=1e-5, rtol=1e-5), "mismatch vs pure-JAX reference"

    # A second, larger batch that exercises multiple grid steps + tail masking.
    x_big = jax.random.normal(k_x, (3000, 1), dtype=jnp.float32)
    out_big = jax.block_until_ready(regression_net_forward(x_big, params, tile_n=1024))
    ref_big = reference_forward(x_big, params)
    assert out_big.shape == (3000, 1)
    assert jnp.allclose(out_big, ref_big, atol=1e-5, rtol=1e-5), "mismatch on large batch"

    print("KERNEL_OK")
</pallas_src>

<mosaic_0001>
module attributes {stable_mosaic.version = 11 : i64} {
  func.func @regression_net_kernel(%arg0: i32, %arg1: memref<1x128xf32, #tpu.memory_space<vmem>>, %arg2: memref<32x1xf32, #tpu.memory_space<vmem>>, %arg3: memref<32x1xf32, #tpu.memory_space<vmem>>, %arg4: memref<32x32xf32, #tpu.memory_space<vmem>>, %arg5: memref<32x1xf32, #tpu.memory_space<vmem>>, %arg6: memref<32x1xf32, #tpu.memory_space<vmem>>, %arg7: memref<1x1xf32, #tpu.memory_space<vmem>>, %arg8: memref<1x128xf32, #tpu.memory_space<vmem>>) attributes {dimension_semantics = [#tpu.dimension_semantics<parallel>], iteration_bounds = array<i64: 1>, scalar_prefetch = 0 : i64, scratch_operands = 0 : i64, tpu.core_type = #tpu.core_type<tc>, window_params = [{transform_indices = @transform_0, window_bounds = array<i64: 1, 128>}, {pipeline_mode = #tpu.pipeline_mode<synchronous>, transform_indices = @transform_1, window_bounds = array<i64: 32, 1>}, {pipeline_mode = #tpu.pipeline_mode<synchronous>, transform_indices = @transform_2, window_bounds = array<i64: 32, 1>}, {pipeline_mode = #tpu.pipeline_mode<synchronous>, transform_indices = @transform_3, window_bounds = array<i64: 32, 32>}, {pipeline_mode = #tpu.pipeline_mode<synchronous>, transform_indices = @transform_4, window_bounds = array<i64: 32, 1>}, {pipeline_mode = #tpu.pipeline_mode<synchronous>, transform_indices = @transform_5, window_bounds = array<i64: 32, 1>}, {pipeline_mode = #tpu.pipeline_mode<synchronous>, transform_indices = @transform_6, window_bounds = array<i64: 1, 1>}, {transform_indices = @transform_7, window_bounds = array<i64: 1, 128>}]} {
    %c0 = arith.constant 0 : index
    %c0_0 = arith.constant 0 : index
    %0 = vector.load %arg1[%c0, %c0_0] : memref<1x128xf32, #tpu.memory_space<vmem>>, vector<1x128xf32>
    %c0_1 = arith.constant 0 : index
    %c0_2 = arith.constant 0 : index
    %1 = vector.load %arg2[%c0_1, %c0_2] : memref<32x1xf32, #tpu.memory_space<vmem>>, vector<32x1xf32>
    %2 = vector.broadcast %1 : vector<32x1xf32> to vector<32x128xf32>
    %3 = vector.broadcast %0 : vector<1x128xf32> to vector<32x128xf32>
    %4 = arith.mulf %2, %3 : vector<32x128xf32>
    %c0_3 = arith.constant 0 : index
    %c0_4 = arith.constant 0 : index
    %5 = vector.load %arg3[%c0_3, %c0_4] : memref<32x1xf32, #tpu.memory_space<vmem>>, vector<32x1xf32>
    %6 = vector.broadcast %5 : vector<32x1xf32> to vector<32x128xf32>
    %7 = arith.addf %4, %6 : vector<32x128xf32>
    %8 = arith.negf %7 : vector<32x128xf32>
    %9 = math.exp %8 : vector<32x128xf32>
    %cst = arith.constant 1.000000e+00 : f32
    %10 = vector.broadcast %cst : f32 to vector<32x128xf32>
    %11 = arith.addf %10, %9 : vector<32x128xf32>
    %12 = arith.divf %10, %11 : vector<32x128xf32>
    %c0_5 = arith.constant 0 : index
    %c0_6 = arith.constant 0 : index
    %13 = vector.load %arg4[%c0_5, %c0_6] : memref<32x32xf32, #tpu.memory_space<vmem>>, vector<32x32xf32>
    %cst_7 = arith.constant dense<0.000000e+00> : vector<32x128xf32>
    %14 = tpu.matmul %13, %12, %cst_7 {dimension_numbers = #tpu.dot_dimension_numbers<[1], [0], [0], [1], [0, 0, 1, 1], [], []>} : vector<32x32xf32>, vector<32x128xf32>, vector<32x128xf32> -> vector<32x128xf32>
    %c0_8 = arith.constant 0 : index
    %c0_9 = arith.constant 0 : index
    %15 = vector.load %arg5[%c0_8, %c0_9] : memref<32x1xf32, #tpu.memory_space<vmem>>, vector<32x1xf32>
    %16 = vector.broadcast %15 : vector<32x1xf32> to vector<32x128xf32>
    %17 = arith.addf %14, %16 : vector<32x128xf32>
    %18 = math.tanh %17 : vector<32x128xf32>
    %c0_10 = arith.constant 0 : index
    %c0_11 = arith.constant 0 : index
    %19 = vector.load %arg6[%c0_10, %c0_11] : memref<32x1xf32, #tpu.memory_space<vmem>>, vector<32x1xf32>
    %20 = vector.broadcast %19 : vector<32x1xf32> to vector<32x128xf32>
    %21 = arith.mulf %20, %18 : vector<32x128xf32>
    %cst_12 = arith.constant dense<0.000000e+00> : vector<128xf32>
    %22 = vector.multi_reduction <add>, %21, %cst_12 [0] : vector<32x128xf32> to vector<128xf32>
    %23 = vector.shape_cast %22 : vector<128xf32> to vector<1x128xf32>
    %c0_13 = arith.constant 0 : index
    %c0_14 = arith.constant 0 : index
    %24 = vector.load %arg7[%c0_13, %c0_14] : memref<1x1xf32, #tpu.memory_space<vmem>>, vector<1x1xf32>
    %25 = vector.broadcast %24 : vector<1x1xf32> to vector<1x128xf32>
    %26 = arith.addf %23, %25 : vector<1x128xf32>
    %c0_15 = arith.constant 0 : index
    %c0_16 = arith.constant 0 : index
    %27 = vector.load %arg8[%c0_15, %c0_16] : memref<1x128xf32, #tpu.memory_space<vmem>>, vector<1x128xf32>
    tpu.vector_store %arg8[%c0_15, %c0_16], %26 {strides = array<i32>} : memref<1x128xf32, #tpu.memory_space<vmem>>, vector<1x128xf32>,
    return
  }
  func.func @transform_0(%arg0: i32) -> (i32, i32) {
    %c0_i32 = arith.constant 0 : i32
    %c0_i32_0 = arith.constant 0 : i32
    return %c0_i32, %arg0 : i32, i32
  }
  func.func @transform_1(%arg0: i32) -> (i32, i32) {
    %c0_i32 = arith.constant 0 : i32
    %c0_i32_0 = arith.constant 0 : i32
    %c0_i32_1 = arith.constant 0 : i32
    return %c0_i32, %c0_i32_0 : i32, i32
  }
  func.func @transform_2(%arg0: i32) -> (i32, i32) {
    %c0_i32 = arith.constant 0 : i32
    %c0_i32_0 = arith.constant 0 : i32
    %c0_i32_1 = arith.constant 0 : i32
    return %c0_i32, %c0_i32_0 : i32, i32
  }
  func.func @transform_3(%arg0: i32) -> (i32, i32) {
    %c0_i32 = arith.constant 0 : i32
    %c0_i32_0 = arith.constant 0 : i32
    %c0_i32_1 = arith.constant 0 : i32
    return %c0_i32, %c0_i32_0 : i32, i32
  }
  func.func @transform_4(%arg0: i32) -> (i32, i32) {
    %c0_i32 = arith.constant 0 : i32
    %c0_i32_0 = arith.constant 0 : i32
    %c0_i32_1 = arith.constant 0 : i32
    return %c0_i32, %c0_i32_0 : i32, i32
  }
  func.func @transform_5(%arg0: i32) -> (i32, i32) {
    %c0_i32 = arith.constant 0 : i32
    %c0_i32_0 = arith.constant 0 : i32
    %c0_i32_1 = arith.constant 0 : i32
    return %c0_i32, %c0_i32_0 : i32, i32
  }
  func.func @transform_6(%arg0: i32) -> (i32, i32) {
    %c0_i32 = arith.constant 0 : i32
    %c0_i32_0 = arith.constant 0 : i32
    %c0_i32_1 = arith.constant 0 : i32
    return %c0_i32, %c0_i32_0 : i32, i32
  }
  func.func @transform_7(%arg0: i32) -> (i32, i32) {
    %c0_i32 = arith.constant 0 : i32
    %c0_i32_0 = arith.constant 0 : i32
    return %c0_i32, %arg0 : i32, i32
  }
}

</mosaic_0001>

<bundles_post_ra>
// kernel: regression_net_forward.1
= control target key start
LH: loop header
LB: loop body
LE: loop exit
PB: predicated region body
PF: predicated region fallthrough
CT: control target
= control target key end

     0   :  { %v364_v0 = vmov 0   ;;  %vm143_vm0 = vcmask 261120   ;;  %s478_s2 = inlined_call_operand.vmem [shape: f32[32,1], index: 2, kind: input, shape index: {}]   ;;  %s479_s1 = inlined_call_operand.vmem [shape: f32[32,1], index: 1, kind: input, shape index: {}]   ;;  %s480_s6 = inlined_call_operand.<no memory space> [shape: f32[1,1], index: 6, kind: input, shape index: {}]   ;;  %s481_s4 = inlined_call_operand.vmem [shape: f32[32,1], index: 4, kind: input, shape index: {}]   ;;  %s482_s5 = inlined_call_operand.vmem [shape: f32[32,1], index: 5, kind: input, shape index: {}]   ;;  %s483_s3 = inlined_call_operand.vmem [shape: f32[32,32], index: 3, kind: input, shape index: {}]   ;;  %s484_s0 = inlined_call_operand.vmem [shape: f32[1,128], index: 0, kind: input, shape index: {}]   ;;  %s485_s7 = inlined_call_operand.vmem [shape: f32[1,128], index: 7, kind: output, shape index: {}]  }
   0x1   :  { %339 = vset.pattern.permute.xlu1 %v364_v0  ;;  %338 = vset.pattern.permute.xlu0 %v364_v0  ;;  %v66_v1 = vld [vmem:[%s478_s2 + $0x18] sm:$0xff]  ;;  %v12_v3 = vstv %s480_s6  ;;  %v31_v4 = vld [vmem:[%s479_s1 + $0x10] sm:$0xff]  ;;  %v30_v5 = vld [vmem:[%s479_s1 + $0x8] sm:$0xff] }
   0x2   :  { %v32_v2 = vld [vmem:[%s479_s1 + $0x18] sm:$0xff]  ;;  %84 = vperm.xlu1 %339, %v66_v1   ;;  %13 = vst [vmem:[#allocation2] sm:$0x1] %v12_v3  ;;  %v65_v6 = vld [vmem:[%s478_s2 + $0x10] sm:$0xff]  ;;  %v29_v7 = vld [vmem:[%s479_s1] sm:$0xff] }
   0x3   :  { %50 = vperm.xlu0 %338, %v32_v2   ;;  %v64_v8 = vld [vmem:[%s478_s2 + $0x8] sm:$0xff]  ;;  %v63_v9 = vld [vmem:[%s478_s2] sm:$0xff]  ;;  %v121_v12 = vld [vmem:[%s481_s4 + $0x10] sm:$0xff] }
   0x4   :  { %v119_v10 = vld [vmem:[%s481_s4] sm:$0xff]  ;;  %v120_v11 = vld [vmem:[%s481_s4 + $0x8] sm:$0xff]  ;;  %v122_v13 = vld [vmem:[%s481_s4 + $0x18] sm:$0xff] }
   0x5   :  { %v245_v14 = vld [vmem:[%s482_s5] sm:$0xff]  ;;  %v246_v15 = vld [vmem:[%s482_s5 + $0x8] sm:$0xff]  ;;  %v247_v16 = vld [vmem:[%s482_s5 + $0x10] sm:$0xff] }
   0x6   :  { %40 = vperm.xlu1 %339, %v30_v5   ;;  %v248_v17 = vld [vmem:[%s482_s5 + $0x18] sm:$0xff]  ;;  %v115_v19 = vld [vmem:[%s483_s3] sm:$0xff]  ;;  %v117_v20 = vld [vmem:[%s483_s3 + $0x10] sm:$0xff] }
   0x7   :  { %45 = vperm.xlu0 %338, %v31_v4   ;;  %323 = vmatprep.mubr.msk.f32.mxu0 %vm143_vm0, %v115_v19  ;;  %v298_v21 = vld [vmem:[%s484_s0] ss:$0 sm:$0xff]  ;;  %v116_v54 = vld [vmem:[%s483_s3 + $0x8] sm:$0xff]  ;;  %v118_v55 = vld [vmem:[%s483_s3 + $0x18] sm:$0xff] }
   0x8   :  { %326 = vmatprep.mubr.msk.f32.mxu1 %vm143_vm0, %v117_v20 }
   0x9   :  { %v282_v18 = vld [vmem:[#allocation2] sm:$0x1] }
   0xa   :  { %35 = vperm.xlu1 %339, %v29_v7  }
   0xb   :  { %79 = vperm.xlu0 %338, %v65_v6  }
   0xe   :  { %69 = vperm.xlu1 %339, %v63_v9  }
   0xf   :  { %74 = vperm.xlu0 %338, %v64_v8  }
  0x12   :  { %130 = vperm.xlu1 %339, %v120_v11  }
  0x13   :  { %125 = vperm.xlu0 %338, %v119_v10  }
  0x16   :  { %140 = vperm.xlu1 %339, %v122_v13  }
  0x17   :  { %135 = vperm.xlu0 %338, %v121_v12  }
  0x1a   :  { %256 = vperm.xlu1 %339, %v246_v15  }
  0x1b   :  { %251 = vperm.xlu0 %338, %v245_v14  }
  0x1e   :  { %266 = vperm.xlu1 %339, %v248_v17  }
  0x1f   :  { %261 = vperm.xlu0 %338, %v247_v16  }
  0x23   :  { %285 = vperm.xlu0 %338, %v282_v18   ;;  %v288_v18 = vlaneseq }
  0x7d   :  { %v85_v22 = vpop.permute.xlu1 %84 }
  0x7e   :  { %v51_v23 = vpop.permute.xlu0 %50 }
  0x7f   :  { %v62_v24 = vmul.f32 %v298_v21, %v51_v23 }
  0x81   :  { %v90_v25 = vadd.f32 %v85_v22, %v62_v24  ;;  %v41_v27 = vpop.permute.xlu1 %40 }
  0x82   :  { %v46_v26 = vpop.permute.xlu0 %45  ;;  %v60_v33 = vmul.f32 %v298_v21, %v41_v27 }
  0x83   :  { %v302_v28 = vmul.f32 -1.442695, %v90_v25  ;;  %v61_v29 = vmul.f32 %v298_v21, %v46_v26 }
  0x85   :  { %340 = vpow2.f32 %v302_v28  ;;  %v36_v31 = vpop.permute.xlu1 %35 }
  0x86   :  { %v80_v30 = vpop.permute.xlu0 %79  ;;  %v59_v35 = vmul.f32 %v298_v21, %v36_v31  ;;  %v289_v21 = vshrl.u32 %v288_v18, 7 }
  0x87   :  { %v89_v32 = vadd.f32 %v80_v30, %v61_v29 }
  0x88   :  { %v290_v24 = vsub.s32 0, %v289_v21 }
  0x89   :  { %v301_v34 = vmul.f32 -1.442695, %v89_v32  ;;  %v70_v37 = vpop.permute.xlu1 %69 }
  0x8a   :  { %v75_v36 = vpop.permute.xlu0 %74  ;;  %v87_v39 = vadd.f32 %v70_v37, %v59_v35 }
  0x8b   :  { %342 = vpow2.f32 %v301_v34  ;;  %v88_v38 = vadd.f32 %v75_v36, %v60_v33 }
  0x8c   :  { %v299_v41 = vmul.f32 -1.442695, %v87_v39 }
  0x8d   :  { %v300_v40 = vmul.f32 -1.442695, %v88_v38  ;;  %v131_v57 = vpop.permute.xlu1 %130 }
  0x8e   :  { %v126_v56 = vpop.permute.xlu0 %125 }
  0x8f   :  { %344 = vpow2.f32 %v300_v40 }
  0x90   :  { %346 = vpow2.f32 %v299_v41 }
  0x91   :  { %v141_v61 = vpop.permute.xlu1 %140 }
  0x92   :  { %v341_v42 = vpop.eup %340  ;;  %v136_v60 = vpop.permute.xlu0 %135 }
  0x93   :  { %v106_v43 = vadd.f32 1.0, %v341_v42 }
  0x95   :  { %348 = vrcp.f32 %v106_v43  ;;  %v257_v6 = vpop.permute.xlu1 %256 }
  0x96   :  { %v252_v4 = vpop.permute.xlu0 %251 }
  0x98   :  { %v343_v44 = vpop.eup %342 }
  0x99   :  { %v105_v45 = vadd.f32 1.0, %v343_v44  ;;  %v267_v15 = vpop.permute.xlu1 %266 }
  0x9a   :  { %v262_v12 = vpop.permute.xlu0 %261 }
  0x9b   :  { %350 = vrcp.f32 %v105_v45 }
  0x9c   :  { %v345_v46 = vpop.eup %344 }
  0x9d   :  { %v347_v47 = vpop.eup %346  ;;  %v104_v48 = vadd.f32 1.0, %v345_v46 }
  0x9e   :  { %v103_v49 = vadd.f32 1.0, %v347_v47  ;;  %v286_v26 = vpop.permute.xlu0 %285 }
  0x9f   :  { %352 = vrcp.f32 %v104_v48  ;;  %v291_v28 = vrot.slane %v286_v26, %v290_v24 }
  0xa0   :  { %354 = vrcp.f32 %v103_v49 }
  0xa2   :  { %v349_v50 = vpop.eup %348 }
  0xa3   :  { %315 = vmatprep.subr.mxu0 %v349_v50  ;;  %329 = vmatprep.subr.mxu1 %v349_v50 }
  0xa4   :  { %316 = vmatpush3.msra.mxu0 %v349_v50  ;;  %333 = vmatpush3.msra.mxu1 %v349_v50 }
  0xa8   :  { %v351_v51 = vpop.eup %350 }
  0xa9   :  { %317 = vmatprep.subr.mxu0 %v351_v51  ;;  %330 = vmatprep.subr.mxu1 %v351_v51 }
  0xaa   :  { %318 = vmatpush3.msra.mxu0 %v351_v51  ;;  %334 = vmatpush3.msra.mxu1 %v351_v51 }
  0xac   :  { %v353_v52 = vpop.eup %352 }
  0xad   :  { %319 = vmatprep.subr.mxu0 %v353_v52  ;;  %331 = vmatprep.subr.mxu1 %v353_v52  ;;  %v355_v53 = vpop.eup %354 }
  0xae   :  { %320 = vmatpush3.msra.mxu0 %v353_v52  ;;  %335 = vmatpush3.msra.mxu1 %v353_v52 }
  0xaf   :  { %321 = vmatprep.subr.mxu0 %v355_v53  ;;  %332 = vmatprep.subr.mxu1 %v355_v53 }
  0xb0   :  { %322 = vmatpush3.msra.mxu0 %v355_v53  ;;  %336 = vmatpush3.msra.mxu1 %v355_v53 }
  0xb1   :  { %324 = vmatmul.mubr.msk.f32.vlgmr.msra.gmra.mxu0 %vm143_vm0, %v116_v54  ;;  %327 = vmatmul.mubr.msk.f32.vlgmr.msra.gmra.mxu1 %vm143_vm0, %v118_v55 }
 0x171   :  { %v325_v58 = vpop.f32.mrf.mxu0  ;;  %v328_v59 = vpop.f32.mrf.mxu1 }
 0x172   :  { %v228_v62 = vadd.f32 %v325_v58, %v131_v57  ;;  %v238_v1 = vadd.f32 %v328_v59, %v141_v61 }
 0x173   :  { %v222_v63 = vpop.f32.mrf.mxu0  ;;  %v232_v0 = vpop.f32.mrf.mxu1 }
 0x174   :  { %356 = vtanh.f32 %v228_v62  ;;  %v223_v2 = vadd.f32 %v222_v63, %v126_v56  ;;  %v233_v3 = vadd.f32 %v232_v0, %v136_v60 }
 0x176   :  { %358 = vtanh.f32 %v223_v2 }
 0x177   :  { %360 = vtanh.f32 %v233_v3 }
 0x178   :  { %362 = vtanh.f32 %v238_v1 }
 0x181   :  { %v357_v5 = vpop.eup %356 }
 0x182   :  { %v270_v9 = vmul.f32 %v357_v5, %v257_v6 }
 0x183   :  { %v359_v7 = vpop.eup %358 }
 0x184   :  { %v361_v8 = vpop.eup %360  ;;  %v269_v10 = vmul.f32 %v359_v7, %v252_v4 }
 0x185   :  { %v363_v11 = vpop.eup %362  ;;  %v271_v14 = vmul.f32 %v361_v8, %v262_v12 }
 0x186   :  { %v273_v13 = vadd.f32 %v270_v9, %v269_v10  ;;  %v272_v16 = vmul.f32 %v363_v11, %v267_v15 }
 0x188   :  { %v274_v17 = vadd.f32 %v273_v13, %v271_v14 }
 0x18a   :  { %v275_v19 = vadd.f32 %v274_v17, %v272_v16 }
 0x18c   :  { %v276_v20 = vrot.slane %v275_v19, 4 }
 0x18e   :  { %v277_v22 = vadd.f32 %v276_v20, %v275_v19 }
 0x190   :  { %v278_v23 = vrot.slane %v277_v22, 2 }
 0x192   :  { %v279_v25 = vadd.f32 %v278_v23, %v277_v22 }
 0x194   :  { %v280_v27 = vrot.slane %v279_v25, 1 }
 0x196   :  { %v281_v29 = vadd.f32 %v280_v27, %v279_v25 }
 0x198   :  { %v292_v30 = vadd.f32 %v291_v28, %v281_v29 }
 0x19a   :  { %293 = vst [vmem:[%s485_s7] sm:$0x1] %v292_v30 }

</bundles_post_ra>
